<compile_context>
chip_gen: v5e
topology: v5e:2x2
jax: 0.10.0
libtpu: 0.0.40
codegen_flags: <defaults>
</compile_context>

<pallas_src>
import functools

import numpy as np
import jax
import jax.numpy as jnp
from jax.experimental import pallas as pl
from jax.experimental.pallas import tpu as pltpu


# ------------------------------- kernel --------------------------------------

def _transition_kernel(x_ref, bn_ref, g_ref, w_ref, b_ref, o_ref, *,
                       img_elems, lblk, qblk, last_row_start,
                       mask_tail, fix_last_row, mxu_dtype):
    """One (image, output-row-tile) grid step.

    x_ref : (1, C, lblk)   flattened NCHW pixels (lane-dense, C on sublanes)
    bn_ref: (2, C, 1)      folded BN scale / shift (f32)
    g_ref : (lblk, qblk)   pooling matrix: 2x2 ceil_mode avg-pool weights +
                           spatial de-interleave folded into one MXU operand
    w_ref : (Co, C)        1x1 conv weight (mxu_dtype)
    b_ref : (Co, 1)        1x1 conv bias (f32)
    o_ref : (1, Co, qblk)  pooled output pixels, lane-dense
    """
    hb = pl.program_id(1)

    # BatchNorm (eval-mode, folded) + ReLU in f32 on the VPU (v5e-safe).
    x = x_ref[0].astype(jnp.float32)                       # (C, lblk)
    act = jnp.maximum(x * bn_ref[0] + bn_ref[1], 0.0)

    # Ragged tail: zero lanes past the real H*W extent of the image
    # (ceil_mode bottom rows / non-dividing row tile).  The `where` also kills
    # any garbage from the partially out-of-bounds last input block.
    if mask_tail:
        lane = jax.lax.broadcasted_iota(jnp.int32, (1, lblk), 1)
        act = jnp.where(hb * lblk + lane < img_elems, act, 0.0)

    # AvgPool2d(2, 2, ceil_mode=True) + de-interleave as one MXU matmul, then
    # the 1x1 conv as a channel matmul (pool commuted before the conv).
    pooled = jnp.dot(act.astype(mxu_dtype), g_ref[...],
                     preferred_element_type=jnp.float32)   # (C, qblk)
    y = jnp.dot(w_ref[...], pooled.astype(mxu_dtype),
                preferred_element_type=jnp.float32)        # (Co, qblk)

    # Odd H with a shared (per-tile) pooling matrix: the last output row only
    # has one valid input row, so its divisor is 2x what G applied.
    if fix_last_row:
        q = jax.lax.broadcasted_iota(jnp.int32, (1, qblk), 1)
        y = y * jnp.where(hb * qblk + q >= last_row_start, 2.0, 1.0)

    o_ref[0] = (y + b_ref[...]).astype(o_ref.dtype)


# ----------------------- pooling matrix / tile selection ----------------------

def _build_pool_matrix(H, W, tho, lblk, exact_rows, dtype):
    """(lblk, tho*Wo) matrix G so that  pooled_block = act_block(C, lblk) @ G.

    act_block lanes are row-major flattened (h, w) positions of 2*tho input
    rows; column t*Wo+vo is output pixel (row t within the tile, column vo).
    Entries are the AvgPool2d(2, 2, ceil_mode=True) weights (divisor = number
    of valid window elements).  With exact_rows=False the row divisor is fixed
    at 2 (interior value); the odd-H last-row divisor is fixed in-kernel.
    """
    Wo = (W + 1) // 2
    g = np.zeros((lblk, tho * Wo), np.float32)
    for t in range(tho):
        for dy in range(2):
            if exact_rows:
                if 2 * t + dy >= H:
                    continue
                rw = 1.0 / (2.0 if 2 * t + 1 < H else 1.0)
            else:
                rw = 0.5
            for vo in range(Wo):
                cden = 2.0 if 2 * vo + 1 < W else 1.0
                for dx in range(2):
                    if 2 * vo + dx >= W:
                        continue
                    l = (2 * t + dy) * W + 2 * vo + dx
                    if l >= lblk:
                        continue
                    g[l, t * Wo + vo] = rw / cden
    return jnp.asarray(g, dtype)


_VMEM_TILE_BUDGET = 24 * 1024 * 1024   # working-set target; fits v7x's 64 MiB


def _estimate_vmem(C, Co, lblk, qblk, x_item, out_item, mxu_item):
    b = 2 * C * lblk * x_item                 # double-buffered input blocks
    b += 2 * Co * qblk * out_item             # double-buffered output blocks
    b += 2 * lblk * qblk * mxu_item           # pooling matrix
    b += 2 * (2 * C + Co * C + Co) * 4        # bn / w / bias
    b += C * lblk * 4 + (C + Co) * qblk * 4   # f32 in-kernel temporaries
    return b


def _choose_row_tile(C, Co, H, W, x_item, out_item, mxu_item, spatial_tile):
    """Returns tho (output rows per grid step), or None for whole-image blocks."""
    Ho, Wo = (H + 1) // 2, (W + 1) // 2
    if spatial_tile is not None:
        if spatial_tile >= Ho:
            return None
        if (2 * spatial_tile * W) % 128 or (spatial_tile * Wo) % 128:
            raise ValueError(
                "spatial_tile must give 128-lane-aligned input/output blocks")
        return spatial_tile
    if _estimate_vmem(C, Co, H * W, Ho * Wo, x_item, out_item,
                      mxu_item) <= _VMEM_TILE_BUDGET:
        return None
    for tho in range(Ho - 1, 0, -1):
        if (2 * tho * W) % 128 or (tho * Wo) % 128:
            continue
        if _estimate_vmem(C, Co, 2 * tho * W, tho * Wo, x_item, out_item,
                          mxu_item) <= _VMEM_TILE_BUDGET:
            return tho
    return None   # no aligned tiling found; fall back to whole-image blocks


# ------------------------------ forward (NCHW API) ----------------------------

def transition_layer_forward(x_nchw, params, *, mxu_dtype=None,
                             spatial_tile=None):
    """BatchNorm(eval) -> ReLU -> Conv1x1 -> AvgPool2d(2, 2, ceil_mode=True)."""
    N, C, H, W = x_nchw.shape
    Co = params["w"].shape[0]
    Ho, Wo = (H + 1) // 2, (W + 1) // 2
    out_dtype = x_nchw.dtype
    if mxu_dtype is None:   # bf16 MXU operands for bf16 callers (v6e/v7x win)
        mxu_dtype = jnp.bfloat16 if x_nchw.dtype == jnp.bfloat16 else jnp.float32

    x_item = jnp.dtype(x_nchw.dtype).itemsize
    out_item = jnp.dtype(out_dtype).itemsize
    mxu_item = jnp.dtype(mxu_dtype).itemsize

    tho = _choose_row_tile(C, Co, H, W, x_item, out_item, mxu_item, spatial_tile)
    if tho is None:                       # whole image per grid step
        lblk, qblk, nhb, exact = H * W, Ho * Wo, 1, True
    else:                                 # tho output rows per grid step
        lblk, qblk, nhb, exact = 2 * tho * W, tho * Wo, -(-Ho // tho), False

    mask_tail = (not exact) and (nhb * lblk > H * W)
    fix_last_row = (not exact) and (H % 2 == 1)

    g = _build_pool_matrix(H, W, Ho if exact else tho, lblk, exact, mxu_dtype)

    # Free layout changes only (contiguous trailing-dim merges); no HBM pass.
    x3 = x_nchw.reshape(N, C, H * W)
    bn = jnp.stack([params["bn_scale"], params["bn_shift"]],
                   axis=0).reshape(2, C, 1).astype(jnp.float32)
    w = params["w"].astype(mxu_dtype)
    b = params["b"].reshape(Co, 1).astype(jnp.float32)

    kernel = functools.partial(
        _transition_kernel,
        img_elems=H * W, lblk=lblk, qblk=qblk,
        last_row_start=(Ho - 1) * Wo,
        mask_tail=mask_tail, fix_last_row=fix_last_row, mxu_dtype=mxu_dtype)

    est = _estimate_vmem(C, Co, lblk, qblk, x_item, out_item, mxu_item)
    vmem_limit = int(min(max(est * 3 // 2, 32 * 1024 * 1024),
                         64 * 1024 * 1024))

    flops = N * nhb * (2 * C * lblk * qblk + 2 * Co * C * qblk + 5 * C * lblk)
    bytes_accessed = (N * C * H * W * x_item + N * Co * Ho * Wo * out_item
                      + lblk * qblk * mxu_item + (2 * C + Co * C + Co) * 4)

    out3 = pl.pallas_call(
        kernel,
        out_shape=jax.ShapeDtypeStruct((N, Co, Ho * Wo), out_dtype),
        grid_spec=pltpu.PrefetchScalarGridSpec(
            num_scalar_prefetch=0,
            grid=(N, nhb),
            in_specs=[
                pl.BlockSpec((1, C, lblk), lambda n, h: (n, 0, h)),
                pl.BlockSpec((2, C, 1), lambda n, h: (0, 0, 0)),
                pl.BlockSpec((lblk, qblk), lambda n, h: (0, 0)),
                pl.BlockSpec((Co, C), lambda n, h: (0, 0)),
                pl.BlockSpec((Co, 1), lambda n, h: (0, 0)),
            ],
            out_specs=pl.BlockSpec((1, Co, qblk), lambda n, h: (n, 0, h)),
        ),
        compiler_params=pltpu.CompilerParams(
            dimension_semantics=("parallel", "parallel"),
            vmem_limit_bytes=vmem_limit),
        cost_estimate=pl.CostEstimate(
            flops=flops, transcendentals=0, bytes_accessed=bytes_accessed),
    )(x3, bn, g, w, b)

    return out3.reshape(N, Co, Ho, Wo)


# ------------------------------ parameter setup -------------------------------

def _fold_bn(gamma, beta, mean, var, eps=1e-5):
    scale = gamma / jnp.sqrt(var + eps)
    shift = beta - mean * scale
    return scale, shift


def init_transition_params(key, in_channels, out_channels):
    k1, k2, k3, k4, k5, k6 = jax.random.split(key, 6)
    gamma = 1.0 + 0.1 * jax.random.normal(k1, (in_channels,), jnp.float32)
    beta = 0.1 * jax.random.normal(k2, (in_channels,), jnp.float32)
    mean = 0.1 * jax.random.normal(k3, (in_channels,), jnp.float32)
    var = 1.0 + 0.1 * jnp.abs(jax.random.normal(k4, (in_channels,), jnp.float32))
    scale, shift = _fold_bn(gamma, beta, mean, var)
    w = 0.1 * jax.random.normal(k5, (out_channels, in_channels), jnp.float32)
    b = 0.05 * jax.random.normal(k6, (out_channels,), jnp.float32)
    return dict(bn_scale=scale, bn_shift=shift, w=w, b=b)


# ------------------------------ pure-JAX reference -----------------------------
# Matches the PyTorch op order exactly: BN -> ReLU -> conv1x1 -> AvgPool2d
# (kernel=2, stride=2, ceil_mode=True, padding=0 => divisor = valid count).

def transition_layer_reference(x_nchw, params):
    x = x_nchw.astype(jnp.float32)
    N, C, H, W = x.shape
    s = params["bn_scale"].reshape(1, C, 1, 1)
    t = params["bn_shift"].reshape(1, C, 1, 1)
    a = jnp.maximum(x * s + t, 0.0)
    y = jnp.einsum("nchw,oc->nohw", a, params["w"]) \
        + params["b"].reshape(1, -1, 1, 1)
    Co = y.shape[1]
    Ho, Wo = (H + 1) // 2, (W + 1) // 2
    yp = jnp.pad(y, ((0, 0), (0, 0), (0, 2 * Ho - H), (0, 2 * Wo - W)))
    win_sum = yp.reshape(N, Co, Ho, 2, Wo, 2).sum(axis=(3, 5))
    rows = jnp.where(2 * jnp.arange(Ho) + 1 < H, 2, 1)
    cols = jnp.where(2 * jnp.arange(Wo) + 1 < W, 2, 1)
    count = (rows[:, None] * cols[None, :]).astype(jnp.float32)
    return win_sum / count


# ------------------------------------ main -------------------------------------

if __name__ == "__main__":
    key = jax.random.PRNGKey(0)

    def check(x, params, tol, **kw):
        out = jax.block_until_ready(transition_layer_forward(x, params, **kw))
        N, C, H, W = x.shape
        Ho, Wo = (H + 1) // 2, (W + 1) // 2
        assert out.shape == (N, params["w"].shape[0], Ho, Wo), out.shape
        ref = transition_layer_reference(x, params)
        err = float(jnp.max(jnp.abs(out.astype(jnp.float32) - ref)))
        assert err < tol, f"mismatch vs reference: {err}"

    # 1) Odd H and W (exercises AvgPool2d ceil_mode), whole-image blocks, f32.
    x1 = jax.random.normal(jax.random.fold_in(key, 1), (2, 16, 17, 15),
                           jnp.float32)
    p1 = init_transition_params(jax.random.fold_in(key, 2), 16, 8)
    check(x1, p1, 1e-4)

    # 2) Forced row-tiled grid (128-aligned blocks) + odd-H ragged tail, f32.
    x2 = jax.random.normal(jax.random.fold_in(key, 3), (2, 16, 17, 64),
                           jnp.float32)
    p2 = init_transition_params(jax.random.fold_in(key, 4), 16, 8)
    check(x2, p2, 1e-4, spatial_tile=4)

    # 3) bf16 DMA path + bf16 MXU operands (f32 accumulation), even H/W.
    x3 = jax.random.normal(jax.random.fold_in(key, 5), (2, 32, 16, 16),
                           jnp.float32).astype(jnp.bfloat16)
    p3 = init_transition_params(jax.random.fold_in(key, 6), 32, 16)
    check(x3, p3, 5e-2)

    print("KERNEL_OK")
</pallas_src>

<mosaic_0001>
module attributes {stable_mosaic.version = 11 : i64} {
  func.func @_transition_kernel(%arg0: i32, %arg1: i32, %arg2: memref<1x16x255xf32, #tpu.memory_space<vmem>>, %arg3: memref<2x16x1xf32, #tpu.memory_space<vmem>>, %arg4: memref<255x72xf32, #tpu.memory_space<vmem>>, %arg5: memref<8x16xf32, #tpu.memory_space<vmem>>, %arg6: memref<8x1xf32, #tpu.memory_space<vmem>>, %arg7: memref<1x8x72xf32, #tpu.memory_space<vmem>>) attributes {dimension_semantics = [#tpu.dimension_semantics<parallel>, #tpu.dimension_semantics<parallel>], iteration_bounds = array<i64: 2, 1>, scalar_prefetch = 0 : i64, scratch_operands = 0 : i64, tpu.core_type = #tpu.core_type<tc>, window_params = [{transform_indices = @transform_0, window_bounds = array<i64: 1, 16, 255>}, {pipeline_mode = #tpu.pipeline_mode<synchronous>, transform_indices = @transform_1, window_bounds = array<i64: 2, 16, 1>}, {pipeline_mode = #tpu.pipeline_mode<synchronous>, transform_indices = @transform_2, window_bounds = array<i64: 255, 72>}, {pipeline_mode = #tpu.pipeline_mode<synchronous>, transform_indices = @transform_3, window_bounds = array<i64: 8, 16>}, {pipeline_mode = #tpu.pipeline_mode<synchronous>, transform_indices = @transform_4, window_bounds = array<i64: 8, 1>}, {transform_indices = @transform_5, window_bounds = array<i64: 1, 8, 72>}]} {
    %c0 = arith.constant 0 : index
    %c0_0 = arith.constant 0 : index
    %c0_1 = arith.constant 0 : index
    %0 = vector.load %arg2[%c0, %c0_0, %c0_1] : memref<1x16x255xf32, #tpu.memory_space<vmem>>, vector<1x16x255xf32>
    %1 = vector.shape_cast %0 : vector<1x16x255xf32> to vector<16x255xf32>
    %c0_2 = arith.constant 0 : index
    %c0_3 = arith.constant 0 : index
    %c0_4 = arith.constant 0 : index
    %2 = vector.load %arg3[%c0_2, %c0_3, %c0_4] : memref<2x16x1xf32, #tpu.memory_space<vmem>>, vector<1x16x1xf32>
    %3 = vector.shape_cast %2 : vector<1x16x1xf32> to vector<16x1xf32>
    %4 = vector.broadcast %3 : vector<16x1xf32> to vector<16x255xf32>
    %5 = arith.mulf %1, %4 : vector<16x255xf32>
    %c1 = arith.constant 1 : index
    %c0_5 = arith.constant 0 : index
    %c0_6 = arith.constant 0 : index
    %6 = vector.load %arg3[%c1, %c0_5, %c0_6] : memref<2x16x1xf32, #tpu.memory_space<vmem>>, vector<1x16x1xf32>
    %7 = vector.shape_cast %6 : vector<1x16x1xf32> to vector<16x1xf32>
    %8 = vector.broadcast %7 : vector<16x1xf32> to vector<16x255xf32>
    %9 = arith.addf %5, %8 : vector<16x255xf32>
    %cst = arith.constant 0.000000e+00 : f32
    %10 = vector.broadcast %cst : f32 to vector<16x255xf32>
    %11 = arith.maximumf %9, %10 : vector<16x255xf32>
    %c0_7 = arith.constant 0 : index
    %c0_8 = arith.constant 0 : index
    %12 = vector.load %arg4[%c0_7, %c0_8] : memref<255x72xf32, #tpu.memory_space<vmem>>, vector<255x72xf32>
    %cst_9 = arith.constant dense<0.000000e+00> : vector<16x72xf32>
    %13 = tpu.matmul %11, %12, %cst_9 {dimension_numbers = #tpu.dot_dimension_numbers<[1], [0], [0], [1], [0, 0, 1, 1], [], []>} : vector<16x255xf32>, vector<255x72xf32>, vector<16x72xf32> -> vector<16x72xf32>
    %c0_10 = arith.constant 0 : index
    %c0_11 = arith.constant 0 : index
    %14 = vector.load %arg5[%c0_10, %c0_11] : memref<8x16xf32, #tpu.memory_space<vmem>>, vector<8x16xf32>
    %cst_12 = arith.constant dense<0.000000e+00> : vector<8x72xf32>
    %15 = tpu.matmul %14, %13, %cst_12 {dimension_numbers = #tpu.dot_dimension_numbers<[1], [0], [0], [1], [0, 0, 1, 1], [], []>} : vector<8x16xf32>, vector<16x72xf32>, vector<8x72xf32> -> vector<8x72xf32>
    %c0_13 = arith.constant 0 : index
    %c0_14 = arith.constant 0 : index
    %16 = vector.load %arg6[%c0_13, %c0_14] : memref<8x1xf32, #tpu.memory_space<vmem>>, vector<8x1xf32>
    %17 = vector.broadcast %16 : vector<8x1xf32> to vector<8x72xf32>
    %18 = arith.addf %15, %17 : vector<8x72xf32>
    %c0_15 = arith.constant 0 : index
    %c0_16 = arith.constant 0 : index
    %c0_17 = arith.constant 0 : index
    %19 = vector.load %arg7[%c0_15, %c0_16, %c0_17] : memref<1x8x72xf32, #tpu.memory_space<vmem>>, vector<1x8x72xf32>
    %20 = vector.shape_cast %19 : vector<1x8x72xf32> to vector<8x72xf32>
    %21 = vector.shape_cast %18 : vector<8x72xf32> to vector<1x8x72xf32>
    tpu.vector_store %arg7[%c0_15, %c0_16, %c0_17], %21 {strides = array<i32>} : memref<1x8x72xf32, #tpu.memory_space<vmem>>, vector<1x8x72xf32>,
    return
  }
  func.func @transform_0(%arg0: i32, %arg1: i32) -> (i32, i32, i32) {
    %c0_i32 = arith.constant 0 : i32
    %c0_i32_0 = arith.constant 0 : i32
    return %arg0, %c0_i32, %arg1 : i32, i32, i32
  }
  func.func @transform_1(%arg0: i32, %arg1: i32) -> (i32, i32, i32) {
    %c0_i32 = arith.constant 0 : i32
    %c0_i32_0 = arith.constant 0 : i32
    %c0_i32_1 = arith.constant 0 : i32
    %c0_i32_2 = arith.constant 0 : i32
    return %c0_i32, %c0_i32_0, %c0_i32_1 : i32, i32, i32
  }
  func.func @transform_2(%arg0: i32, %arg1: i32) -> (i32, i32) {
    %c0_i32 = arith.constant 0 : i32
    %c0_i32_0 = arith.constant 0 : i32
    %c0_i32_1 = arith.constant 0 : i32
    return %c0_i32, %c0_i32_0 : i32, i32
  }
  func.func @transform_3(%arg0: i32, %arg1: i32) -> (i32, i32) {
    %c0_i32 = arith.constant 0 : i32
    %c0_i32_0 = arith.constant 0 : i32
    %c0_i32_1 = arith.constant 0 : i32
    return %c0_i32, %c0_i32_0 : i32, i32
  }
  func.func @transform_4(%arg0: i32, %arg1: i32) -> (i32, i32) {
    %c0_i32 = arith.constant 0 : i32
    %c0_i32_0 = arith.constant 0 : i32
    %c0_i32_1 = arith.constant 0 : i32
    return %c0_i32, %c0_i32_0 : i32, i32
  }
  func.func @transform_5(%arg0: i32, %arg1: i32) -> (i32, i32, i32) {
    %c0_i32 = arith.constant 0 : i32
    %c0_i32_0 = arith.constant 0 : i32
    return %arg0, %c0_i32, %arg1 : i32, i32, i32
  }
}

</mosaic_0001>

<bundles_post_ra>
// kernel: tpu_custom_call.1
= control target key start
LH: loop header
LB: loop body
LE: loop exit
PB: predicated region body
PF: predicated region fallthrough
CT: control target
= control target key end

     0   :  { %10 = vsyncpa [#allocation3], 0  ;;  %s925_s0 = inlined_call_operand.vmem [shape: f32[2,16,255], index: 0, kind: input, shape index: {}]   ;;  %s926_s1 = inlined_call_operand.vmem [shape: f32[2,16,1], index: 1, kind: input, shape index: {}]   ;;  %s927_s2 = inlined_call_operand.vmem [shape: f32[255,72], index: 2, kind: input, shape index: {}]   ;;  %s928_s3 = inlined_call_operand.vmem [shape: f32[8,16], index: 3, kind: input, shape index: {}]   ;;  %s929_s4 = inlined_call_operand.vmem [shape: f32[8,1], index: 4, kind: input, shape index: {}]   ;;  %s930_s5 = inlined_call_operand.hbm [shape: f32[2,8,72], index: 5, kind: output, shape index: {}]  }
   0x1   :  { %12 = vsyncpa [#allocation3 + $0x1], 0  ;;  %s712_s18 = smov 0   ;;  %s714_s19 = smov 0  }
   0x2   :  { %s716_s20 = smov 0   ;;  %s718_s21 = smov 0  }
   0x3   :  { %s720_s22 = smov 0   ;;  %s722_s23 = smov 0  }
   0x4 LB: > { %s507_s24 = sadd.s32 4294967295, %s679_s23   ;;  %s508_s25 = sadd.s32 4294967294, %s679_s23   ;;  %s679_s23 = sphi %s722_s23, %s18_s23   ;;  %s675_s22 = sphi %s720_s22, %s937_s22   ;;  %s671_s21 = sphi %s718_s21, %s936_s21   ;;  %s667_s20 = sphi %s716_s20, %s935_s20   ;;  %s663_s19 = sphi %s714_s19, %s934_s19   ;;  %s659_s18 = sphi %s712_s18, %s933_s18  }
   0x5   : > { %s30_s26 = sadd.s32 1, %s675_s22  ;;  %s151_s27 = sadd.s32 1, %s667_s20 }
   0x6   : > { %p32_p0 = scmp.ge.s32.totalorder %s30_s26, 2  ;;  %p161_p1 = scmp.ne.s32.totalorder %s667_s20, %s663_s19 }
   0x7   : > { %p162_p2 = scmp.eq.s32.totalorder %s507_s24, 1  ;;  %p167_p3 = scmp.ne.s32.totalorder %s663_s19, %s659_s18 }
   0x8   : > { %s939_s26 = smov (%p32_p0, %s30_s26), 0  ;;  %p168_p5 = scmp.eq.s32.totalorder %s508_s25, 1 }
   0x9   : > { %p752_p4 = por %p162_p2, %p161_p1  ;;  %s146_s29 = ssub.s32 %s675_s22, %s939_s26 }
   0xa   : > { %p511_p6 = scmp.ge.s32.totalorder %s679_s23, 1  ;;  %p149_p7 = scmp.eq.s32.totalorder %s146_s29, 0 }
   0xb   : > { %p759_p8 = por %p168_p5, %p167_p3  ;;  %p211_p9 = scmp.lt.s32.totalorder %s679_s23, 3 }
   0xc   : > { %s765_s6 = scalar_select %p149_p7, %s667_s20, %s151_s27  }
   0xd   : > { %p212_p10 = pnand %p511_p6, %p211_p9 }
   0xe   : > { %p244_p11 = scmp.lt.s32.totalorder (!%p212_p10), %s671_s21, 1  ;;  %s240_s13 = sand.u32 (!%p212_p10), 1, %s663_s19  }
   0xf   : > { %215 = sbr.rel (%p212_p10) target bundleno = 425 (0x1a9), region = 40  ;;  %s512_s14 = sshll.u32 (!%p212_p10), %s240_s13, 3 }
  0x10   : > { %s522_s15 = sshll.u32 (!%p212_p10), %s671_s21, 3  ;;  %s417_s7 = scalar_lea.sflag (!%p212_p10), [#allocation3], %s240_s13 }
  0x11   : > { %s428_s24 = scalar_lea.hbm (!%p212_p10), %s930_s5, %s522_s15  ;;  %s621_s11 = scalar_lea.hbm (!%p212_p10), %s930_s5, 16 }
  0x12   : > { %s432_s29 = sshll.u32 (!%p212_p10), %s428_s24, 4  ;;  %s433_s29 = int_to_ptr.hbm [resolvable:$true] %s432_s29 }
  0x14   : > { %v515_v0 = vld [vmem:[%s926_s1 + $0x10] sm:$0xff]  ;;  %v257_v1 = vld [vmem:[%s926_s1] sm:$0xff]  ;;  %vm333_vm0 = vcmask 1046528   ;;  %v681_v2 = vmov 0   ;;  %v309_v3 = vld [vmem:[%s927_s2 + $0x78] sm:$0xff]  ;;  %s245_s25 = scalar_select %p244_p11, %s671_s21, 1 }
  0x15   : > { %599 = vset.pattern.permute.xlu1 %v681_v2  ;;  %598 = vset.pattern.permute.xlu0 %v681_v2  ;;  %v325_v4 = vld [vmem:[%s927_s2 + $0xf8] sm:$0x7f]  ;;  %v308_v5 = vld [vmem:[%s927_s2 + $0x70] sm:$0xff]  ;;  %v307_v7 = vld [vmem:[%s927_s2 + $0x68] sm:$0xff]  ;;  %vm326_vm1 = vcmask 1039360   ;;  %vm390_vm2 = vcmask 130048  }
  0x16   : > { %278 = vperm.xlu1 %599, %v515_v0   ;;  %261 = vperm.xlu0 %598, %v257_v1   ;;  %v324_v6 = vld [vmem:[%s927_s2 + $0xf0] sm:$0xff]  ;;  %v323_v8 = vld [vmem:[%s927_s2 + $0xe8] sm:$0xff]  ;;  %v306_v9 = vld [vmem:[%s927_s2 + $0x60] sm:$0xff]  ;;  %s525_s27 = sshll.u32 %s245_s25, 5  ;;  %s242_s25 = scalar_lea.vmem [#allocation2], %s512_s14  ;;  %vm414_vm3 = vcmask 588800  }
  0x17   : > { %337 = vmatpush.msra.mxu0 %v309_v3  ;;  %517 = vmatpush.msk.msra.mxu1 %vm333_vm0, %v325_v4  ;;  %v322_v10 = vld [vmem:[%s927_s2 + $0xe0] sm:$0xff]  ;;  %v516_v11 = vld [vmem:[%s926_s1 + $0x18] sm:$0xff]  ;;  %v258_v12 = vld [vmem:[%s926_s1 + $0x8] sm:$0xff]  ;;  %s251_s8 = scalar_lea.vmem %s925_s0, %s525_s27  ;;  %s430_s27 = sshll.u32 %s242_s25, 4  ;;  %s431_s27 = int_to_ptr.vmem [resolvable:$true] %s430_s27 }
  0x18   : > { %526 = vmatpush.msra.mxu3 %v309_v3  ;;  %600 = vset.pattern.permute.xlu2 %v681_v2  ;;  %v305_v13 = vld [vmem:[%s927_s2 + $0x58] sm:$0xff]  ;;  %v304_v15 = vld [vmem:[%s927_s2 + $0x50] sm:$0xff]  ;;  %v303_v17 = vld [vmem:[%s927_s2 + $0x48] sm:$0xff] }
  0x19   : > { %338 = vmatpush.msra.mxu0 %v308_v5  ;;  %361 = vmatpush.msra.mxu1 %v324_v6  ;;  %v321_v14 = vld [vmem:[%s927_s2 + $0xd8] sm:$0xff]  ;;  %v320_v16 = vld [vmem:[%s927_s2 + $0xd0] sm:$0xff]  ;;  %v319_v18 = vld [vmem:[%s927_s2 + $0xc8] sm:$0xff] }
  0x1a   : > { %527 = vmatpush.msra.mxu3 %v308_v5  ;;  %v302_v19 = vld [vmem:[%s927_s2 + $0x40] sm:$0xff]  ;;  %v301_v21 = vld [vmem:[%s927_s2 + $0x38] sm:$0xff]  ;;  %v300_v23 = vld [vmem:[%s927_s2 + $0x30] sm:$0xff] }
  0x1b   : > { %339 = vmatpush.msra.mxu0 %v307_v7  ;;  %362 = vmatpush.msra.mxu1 %v323_v8  ;;  %v318_v20 = vld [vmem:[%s927_s2 + $0xc0] sm:$0xff]  ;;  %v317_v22 = vld [vmem:[%s927_s2 + $0xb8] sm:$0xff]  ;;  %v316_v24 = vld [vmem:[%s927_s2 + $0xb0] sm:$0xff] }
  0x1c   : > { %528 = vmatpush.msra.mxu3 %v307_v7  ;;  %v299_v25 = vld [vmem:[%s927_s2 + $0x28] sm:$0xff]  ;;  %v298_v27 = vld [vmem:[%s927_s2 + $0x20] sm:$0xff]  ;;  %v297_v29 = vld [vmem:[%s927_s2 + $0x18] sm:$0xff] }
  0x1d   : > { %340 = vmatpush.msra.mxu0 %v306_v9  ;;  %363 = vmatpush.msra.mxu1 %v322_v10  ;;  %v315_v26 = vld [vmem:[%s927_s2 + $0xa8] sm:$0xff]  ;;  %v314_v28 = vld [vmem:[%s927_s2 + $0xa0] sm:$0xff]  ;;  %v313_v30 = vld [vmem:[%s927_s2 + $0x98] sm:$0xff] }
  0x1e   : > { %283 = vperm.xlu1 %599, %v516_v11   ;;  %266 = vperm.xlu0 %598, %v258_v12   ;;  %v296_v31 = vld [vmem:[%s927_s2 + $0x10] sm:$0xff]  ;;  %v295_v33 = vld [vmem:[%s927_s2 + $0x8] sm:$0xff]  ;;  %v294_v35 = vld [vmem:[%s927_s2] sm:$0xff] }
  0x1f   : > { %341 = vmatpush.msra.mxu0 %v305_v13  ;;  %364 = vmatpush.msra.mxu1 %v321_v14  ;;  %v312_v32 = vld [vmem:[%s927_s2 + $0x90] sm:$0xff]  ;;  %v311_v34 = vld [vmem:[%s927_s2 + $0x88] sm:$0xff]  ;;  %v310_v36 = vld [vmem:[%s927_s2 + $0x80] sm:$0xff] }
  0x20   : > { %529 = vmatpush.msra.mxu3 %v306_v9  ;;  %v253_v37 = vld [vmem:[%s251_s8] sm:$0xff]  ;;  %v254_v38 = vld [vmem:[%s251_s8 + $0x8] sm:$0xff]  ;;  %v255_v47 = vld [vmem:[%s251_s8 + $0x10] sm:$0xff] }
  0x21   : > { %342 = vmatpush.msra.mxu0 %v304_v15  ;;  %365 = vmatpush.msra.mxu1 %v320_v16  ;;  %v256_v48 = vld [vmem:[%s251_s8 + $0x18] sm:$0xff]  ;;  %v384_v57 = vld [vmem:[%s929_s4] sm:$0xff]  ;;  %s615_s8 = sshra.s32 %s433_s29, 4  ;;  %s616_s8 = int_to_ptr.hbm [resolvable:$true] %s615_s8 }
  0x22   : > { %530 = vmatpush.msra.mxu3 %v305_v13  ;;  %387 = vperm.xlu2 %600, %v384_v57   ;;  %v383_v0 = vld [vmem:[%s928_s3] sm:$0xff]  ;;  %s617_s9 = scalar_lea.hbm %s616_s8, 8  ;;  %p622_p1 = scmp.lt.s32.totalorder %s616_s8, %s930_s5 }
  0x23   : > { %343 = vmatpush.msra.mxu0 %v303_v17  ;;  %366 = vmatpush.msra.mxu1 %v319_v18  ;;  %p618_p12 = scmp.ne.s32.totalorder %s616_s8, %s617_s9  ;;  %p623_p2 = scmp.lt.s32.totalorder %s621_s11, %s617_s9 }
  0x24   : > { %531 = vmatpush.msra.mxu3 %v304_v15 }
  0x25   : > { %344 = vmatpush.msra.mxu0 %v302_v19  ;;  %367 = vmatpush.msra.mxu1 %v318_v20  ;;  %p619_p13 = pnand %p618_p12, %p752_p4  ;;  %p624_p3 = por %p623_p2, %p622_p1 }
  0x26   : > { %532 = vmatpush.msra.mxu3 %v303_v17 }
  0x27   : > { %345 = vmatpush.msra.mxu0 %v301_v21  ;;  %368 = vmatpush.msra.mxu1 %v317_v22  ;;  %p620_p0 = pneg %p619_p13 }
  0x28   : > { %533 = vmatpush.msra.mxu3 %v302_v19 }
  0x29   : > { %346 = vmatpush.msra.mxu0 %v300_v23  ;;  %369 = vmatpush.msra.mxu1 %v316_v24  ;;  %p625_p5 = pnand %p624_p3, %p620_p0 }
  0x2a   : > { %534 = vmatpush.msra.mxu3 %v301_v21 }
  0x2b   : > { %347 = vmatpush.msra.mxu0 %v299_v25  ;;  %370 = vmatpush.msra.mxu1 %v315_v26 }
  0x2c   : > { %535 = vmatpush.msra.mxu3 %v300_v23 }
  0x2d   : > { %348 = vmatpush.msra.mxu0 %v298_v27  ;;  %371 = vmatpush.msra.mxu1 %v314_v28 }
  0x2e   : > { %536 = vmatpush.msra.mxu3 %v299_v25 }
  0x2f   : > { %349 = vmatpush.msra.mxu0 %v297_v29  ;;  %372 = vmatpush.msra.mxu1 %v313_v30 }
  0x30   : > { %537 = vmatpush.msra.mxu3 %v298_v27 }
  0x31   : > { %350 = vmatpush.msra.mxu0 %v296_v31  ;;  %373 = vmatpush.msra.mxu1 %v312_v32 }
  0x32   : > { %538 = vmatpush.msra.mxu3 %v297_v29 }
  0x33   : > { %351 = vmatpush.msra.mxu0 %v295_v33  ;;  %374 = vmatpush.msra.mxu1 %v311_v34 }
  0x34   : > { %539 = vmatpush.msra.mxu3 %v296_v31 }
  0x35   : > { %352 = vmatpush.msra.mxu0 %v294_v35  ;;  %375 = vmatpush.msra.mxu1 %v310_v36 }
  0x36   : > { %540 = vmatpush.msra.mxu3 %v295_v33 }
  0x38   : > { %541 = vmatpush.msra.mxu3 %v294_v35 }
  0x7c   : > { %v388_v1 = vpop.permute.xlu2 %387 }
  0x88   : > { %v279_v39 = vpop.permute.xlu1 %278  ;;  %v262_v40 = vpop.permute.xlu0 %261 }
  0x89   : > { %v269_v41 = vmul.f32 %v262_v40, %v253_v37  ;;  %v270_v42 = vmul.f32 %v262_v40, %v254_v38 }
  0x8b   : > { %v287_v43 = vadd.f32 %v279_v39, %v270_v42  ;;  %v286_v44 = vadd.f32 %v279_v39, %v269_v41 }
  0x8d   : > { %v290_v45 = vmax.f32 %v286_v44, 0.0  ;;  %v291_v46 = vmax.f32 %v287_v43, 0.0 }
  0x8f   : > { %353 = vmatmul.f32.vlgmr.msra.gmra.mxu0 %v290_v45  ;;  %518 = vmatmul.msk.f32.vlgmr.msra.gmra.mxu1 %vm326_vm1, %v291_v46 }
  0x90   : > { %v267_v49 = vpop.permute.xlu0 %266  ;;  %v284_v52 = vpop.permute.xlu1 %283 }
  0x91   : > { %v271_v50 = vmul.f32 %v267_v49, %v255_v47  ;;  %v272_v51 = vmul.f32 %v267_v49, %v256_v48 }
  0x93   : > { %v289_v53 = vadd.f32 %v284_v52, %v272_v51  ;;  %v288_v54 = vadd.f32 %v284_v52, %v271_v50 }
  0x95   : > { %v293_v55 = vmax.f32 %v289_v53, 0.0  ;;  %v292_v56 = vmax.f32 %v288_v54, 0.0 }
  0x97   : > { %356 = vmatmul.f32.vlgmr.msra.gmra.mxu3 %v292_v56  ;;  %519 = vmatmul.msk.f32.gmra.mxu1 %vm326_vm1, %v293_v55 }
 0x10c   : > { %v377_v58 = vpop.f32.mrf.mxu1  ;;  %v354_v59 = vpop.f32.mrf.mxu0 }
 0x10d   : > { %v378_v63 = vadd.f32 %v377_v58, %v354_v59 }
 0x114   : > { %v380_v60 = vpop.f32.mrf.mxu1 }
 0x11a   : > { %v357_v61 = vpop.f32.mrf.mxu3 }
 0x11b   : > { %v381_v62 = vadd.f32 %v380_v60, %v357_v61 }
 0x11d   : > { %408 = vmatpush.msra.mxu2 %v381_v62 }
 0x11f   : > { %409 = vmatpush.msra.mxu2 %v378_v63 }
 0x120   : > { %520 = vmatmul.msk.f32.vlgmr.msra.gmra.mxu2 %vm390_vm2, %v383_v0 }
 0x1a3   : > { %v411_v2 = vpop.f32.mrf.mxu2 }
 0x1a4   : > { %v412_v3 = vadd.f32 %v411_v2, %v388_v1 }
 0x1a6   : > { %415 = vst.msk [vmem:[%s242_s25] sm:$0xff] %vm414_vm3, %v412_v3 }
 0x1a7   : > { %628 = shalt.err (!%p625_p5)
}
 0x1a8   : > { %542 = dma.vmem_to_hbm [thread:$0]  (%p752_p4), %s431_s27, 128, %s433_s29, %s417_s7  }
 0x1a9 PF: > { %p548_p6 = scmp.ge.s32.totalorder %s679_s23, 2  ;;  %s444_s13 = sand.u32 1, %s659_s18  }
 0x1aa   : > { %s445_s15 = scalar_lea.sflag [#allocation3], %s444_s13 }
 0x1ab   : > { %p545_p7 = pnand %p548_p6, %p759_p8 }
 0x1ad   : > { %p546_p9 = pneg %p545_p7 }
 0x1af   : > { %654 = dma.done.wait (%p546_p9), %s445_s15, 128  }
 0x1b0   : > { %656 = vsyncadd (%p546_p9), %s445_s15, 4294967168  ;;  %s18_s23 = sadd.s32 1, %s679_s23   ;;  %s933_s18 = smov %s663_s19 }
 0x1b1   : > { %p15_p10 = scmp.ge.s32.totalorder %s18_s23, 4   ;;  %s934_s19 = smov %s667_s20 }
 0x1b2   : > { %s935_s20 = smov %s765_s6  ;;  %s936_s21 = smov %s675_s22 }
 0x1b3   : > { %s937_s22 = smov %s939_s26  ;;  %17 = sbr.rel (!%p15_p10) target bundleno = 4 (0x4), region = 76 }
 0x1b8   :  { %451 = vsyncpa [#allocation3], 1 }
 0x1b9   :  { %453 = vsyncpa [#allocation3 + $0x1], 1 }

</bundles_post_ra>
